<compile_context>
chip_gen: v5e
topology: v5e:2x2
jax: 0.10.0
libtpu: 0.0.40
codegen_flags: <defaults>
</compile_context>

<pallas_src>
import math
import functools

import jax
import jax.numpy as jnp
from jax.experimental import pallas as pl
from jax.experimental.pallas import tpu as pltpu


DEFAULT_MASK_VALUE = -1e30                 # finite -> no inf-inf NaN risk in online softmax
VMEM_LIMIT_BYTES = 32 * 1024 * 1024        # safe on v7x (64 MiB/TC) as well as v5e/v6e


def _pick_tile(dim, want, aligns=(128,)):
    """Largest tile <= min(want, dim) that divides dim and satisfies the best alignment
    in `aligns` (tried in order). Falls back to the full dim (always a legal block)."""
    if isinstance(aligns, int):
        aligns = (aligns,)
    for align in aligns:
        for cand in range(min(want, dim), align - 1, -1):
            if dim % cand == 0 and cand % align == 0:
                return cand
    return dim


def _sublane_aligns(dtype):
    # bf16 packs two rows per sublane -> prefer 16-aligned sublane tiles.
    return (16, 8) if dtype == jnp.bfloat16 else (8,)


# ----------------------------------------------------------------------------- tiled linear
def _linear_kernel(x_ref, w_ref, b_ref, o_ref, acc_ref):
    k = pl.program_id(2)

    @pl.when(k == 0)
    def _init():
        acc_ref[...] = jnp.zeros_like(acc_ref)

    # MXU in the input dtype (bf16), f32 accumulation.
    acc_ref[...] += jnp.dot(x_ref[...], w_ref[...], preferred_element_type=jnp.float32)

    @pl.when(k == pl.num_programs(2) - 1)
    def _finalize():
        o_ref[...] = (acc_ref[...] + b_ref[...].astype(jnp.float32)).astype(o_ref.dtype)


def pallas_linear(x2d, w_t, b, *, block_m=512, block_n=512, block_k=512):
    """y = x2d @ w_t + b with w_t already stored as (in_features, out_features)."""
    M, K = x2d.shape
    K2, N = w_t.shape
    assert K == K2
    tm = _pick_tile(M, block_m, _sublane_aligns(x2d.dtype))
    tn = _pick_tile(N, block_n, (256, 128))   # prefer 256-multiples for the 256-wide MXU
    tk = _pick_tile(K, block_k, (256, 128))
    grid = (M // tm, N // tn, K // tk)
    return pl.pallas_call(
        _linear_kernel,
        out_shape=jax.ShapeDtypeStruct((M, N), x2d.dtype),
        grid_spec=pltpu.PrefetchScalarGridSpec(
            num_scalar_prefetch=0,
            grid=grid,
            in_specs=[
                pl.BlockSpec((tm, tk), lambda i, j, k: (i, k)),
                pl.BlockSpec((tk, tn), lambda i, j, k: (k, j)),
                pl.BlockSpec((1, tn), lambda i, j, k: (0, j)),
            ],
            out_specs=pl.BlockSpec((tm, tn), lambda i, j, k: (i, j)),
            scratch_shapes=[pltpu.VMEM((tm, tn), jnp.float32)],
        ),
        compiler_params=pltpu.CompilerParams(
            dimension_semantics=("parallel", "parallel", "arbitrary"),
            vmem_limit_bytes=VMEM_LIMIT_BYTES,
        ),
    )(x2d, w_t, b.reshape(1, N))


# ----------------------------------------------------------------------------- RoPE + qkv split
def _rope_split_kernel(qkv_ref, cos_ref, sin_ref, q_ref, k_ref, v_ref, *,
                       n_query_groups, q_per_kv, head_size, rope_n_elem):
    hs = head_size
    total_qkv = q_per_kv + 2
    half = rope_n_elem // 2
    cos = cos_ref[...].astype(jnp.float32)                 # (bt, rope_n_elem)
    sin = sin_ref[...].astype(jnp.float32)
    lane = jax.lax.broadcasted_iota(jnp.int32, cos.shape, 1)
    neg_half = lane < half                                 # hoisted (no per-chunk broadcast)

    def rope(chunk):
        # rotate-half via an XLU lane roll + sign select; no jnp.concatenate / VMEM copies.
        rolled = pltpu.roll(chunk, shift=half, axis=1)
        rotated = jnp.where(neg_half, -rolled, rolled)
        return chunk * cos + rotated * sin

    for g in range(n_query_groups):
        base = g * total_qkv * hs
        # query heads of this group
        for n in range(q_per_kv):
            src = base + n * hs
            dst = (g * q_per_kv + n) * hs
            ch = qkv_ref[0, :, src:src + rope_n_elem].astype(jnp.float32)
            q_ref[0, :, dst:dst + rope_n_elem] = rope(ch).astype(q_ref.dtype)
            if rope_n_elem < hs:   # partial rotary: pass the tail lanes through
                q_ref[0, :, dst + rope_n_elem:dst + hs] = qkv_ref[0, :, src + rope_n_elem:src + hs]
        # key head of this group
        ksrc = base + q_per_kv * hs
        ch = qkv_ref[0, :, ksrc:ksrc + rope_n_elem].astype(jnp.float32)
        k_ref[0, :, g * hs:g * hs + rope_n_elem] = rope(ch).astype(k_ref.dtype)
        if rope_n_elem < hs:
            k_ref[0, :, g * hs + rope_n_elem:(g + 1) * hs] = qkv_ref[0, :, ksrc + rope_n_elem:ksrc + hs]
        # value head: pass-through
        vsrc = base + (q_per_kv + 1) * hs
        v_ref[0, :, g * hs:(g + 1) * hs] = qkv_ref[0, :, vsrc:vsrc + hs]


def pallas_rope_split(qkv, cos, sin, *, n_query_groups, q_per_kv, head_size,
                      rope_n_elem, block_t=512):
    """qkv: (B, T, (q_per_kv+2)*n_query_groups*head_size) in litgpt interleave order.
    Returns (q (B,T,H*hs) roped, k (B,T,QG*hs) roped, v (B,T,QG*hs))."""
    B, T, W = qkv.shape
    hs = head_size
    n_head = n_query_groups * q_per_kv
    bt = _pick_tile(T, block_t, _sublane_aligns(qkv.dtype))
    grid = (B, T // bt)
    kernel = functools.partial(_rope_split_kernel, n_query_groups=n_query_groups,
                               q_per_kv=q_per_kv, head_size=hs, rope_n_elem=rope_n_elem)
    return pl.pallas_call(
        kernel,
        out_shape=(jax.ShapeDtypeStruct((B, T, n_head * hs), qkv.dtype),
                   jax.ShapeDtypeStruct((B, T, n_query_groups * hs), qkv.dtype),
                   jax.ShapeDtypeStruct((B, T, n_query_groups * hs), qkv.dtype)),
        grid_spec=pltpu.PrefetchScalarGridSpec(
            num_scalar_prefetch=0,
            grid=grid,
            in_specs=[
                pl.BlockSpec((1, bt, W), lambda b, t: (b, t, 0)),
                pl.BlockSpec((bt, rope_n_elem), lambda b, t: (t, 0)),
                pl.BlockSpec((bt, rope_n_elem), lambda b, t: (t, 0)),
            ],
            out_specs=[
                pl.BlockSpec((1, bt, n_head * hs), lambda b, t: (b, t, 0)),
                pl.BlockSpec((1, bt, n_query_groups * hs), lambda b, t: (b, t, 0)),
                pl.BlockSpec((1, bt, n_query_groups * hs), lambda b, t: (b, t, 0)),
            ],
        ),
        compiler_params=pltpu.CompilerParams(
            dimension_semantics=("parallel", "parallel"),
            vmem_limit_bytes=VMEM_LIMIT_BYTES,
        ),
    )(qkv, cos, sin)


# ----------------------------------------------------------------------------- flash attention
def _flash_attention_kernel(q_ref, k_ref, v_ref, o_ref,
                            q_scr, m_scr, l_scr, acc_scr,
                            *, scale, q_per_kv, head_size, block_q, block_kv):
    i = pl.program_id(2)
    j = pl.program_id(3)
    nk = pl.num_programs(3)
    hs = head_size

    @pl.when(j == 0)
    def _init():
        m_scr[...] = jnp.full_like(m_scr, DEFAULT_MASK_VALUE)
        l_scr[...] = jnp.zeros_like(l_scr)
        acc_scr[...] = jnp.zeros_like(acc_scr)
        # RoPE already pre-applied; fold the softmax scale into q once per q tile.
        q_scr[...] = (q_ref[0].astype(jnp.float32) * scale).astype(q_scr.dtype)

    q_first = i * block_q
    kv_first = j * block_kv
    intersects = kv_first <= q_first + (block_q - 1)    # tile touches the lower triangle
    crosses_diag = kv_first + (block_kv - 1) > q_first  # some entries need masking

    def _step(masked):
        k = k_ref[0]                        # (bkv, hs) -- shared by all heads of the group
        v = v_ref[0]
        if masked:
            q_pos = q_first + jax.lax.broadcasted_iota(jnp.int32, (block_q, block_kv), 0)
            kv_pos = kv_first + jax.lax.broadcasted_iota(jnp.int32, (block_q, block_kv), 1)
            causal = q_pos >= kv_pos
        for n in range(q_per_kv):           # static unroll over heads sharing this K/V tile
            qh = q_scr[:, n * hs:(n + 1) * hs]                     # (bq, hs), 128-aligned slice
            s = jax.lax.dot_general(qh, k, (((1,), (1,)), ((), ())),
                                    preferred_element_type=jnp.float32)
            if masked:
                s = jnp.where(causal, s, DEFAULT_MASK_VALUE)
            m_prev = m_scr[n]                                       # (bq, 1)
            m_new = jnp.maximum(m_prev, jnp.max(s, axis=-1, keepdims=True))
            alpha = jnp.exp(m_prev - m_new)
            p = jnp.exp(s - m_new)
            l_scr[n] = alpha * l_scr[n] + jnp.sum(p, axis=-1, keepdims=True)
            acc_scr[n] = alpha * acc_scr[n] + jnp.dot(p.astype(v.dtype), v,
                                                      preferred_element_type=jnp.float32)
            m_scr[n] = m_new

    # Interior tiles: the causal mask is a no-op -> skip the iota/compare/select work.
    @pl.when(jnp.logical_and(intersects, jnp.logical_not(crosses_diag)))
    def _interior():
        _step(masked=False)

    # Diagonal tiles: apply the causal mask.
    @pl.when(jnp.logical_and(intersects, crosses_diag))
    def _diag():
        _step(masked=True)

    @pl.when(j == nk - 1)
    def _finalize():
        for n in range(q_per_kv):
            inv_l = pl.reciprocal(l_scr[n], approx=True)            # EUP slot, frees the VALU
            o_ref[0, :, n * hs:(n + 1) * hs] = (acc_scr[n] * inv_l).astype(o_ref.dtype)


def pallas_flash_attention(q, k, v, *, scale, n_query_groups, q_per_kv, head_size,
                           block_q=512, block_kv=256):
    """q: (B, T, H*hs) post-RoPE; k, v: (B, T, QG*hs) post-RoPE, per-group (NOT broadcast).
    Returns (B, T, H*hs) lane-dense output."""
    B, T, _ = q.shape
    hs = head_size
    assert hs % 128 == 0, "lane-dense attention path requires head_size % 128 == 0"
    # TODO(synk): add a (B, QG, T, hs) relayout fallback for head_size not a multiple of 128.
    aligns = _sublane_aligns(q.dtype)
    bq = _pick_tile(T, block_q, aligns)
    bkv = _pick_tile(T, block_kv, aligns)
    grid = (B, n_query_groups, T // bq, T // bkv)

    q_spec = pl.BlockSpec((1, bq, q_per_kv * hs), lambda b, g, i, j: (b, i, g))

    # Causal DMA elision: clamp the kv block index so above-diagonal K/V tiles repeat the
    # previous block index and Pallas skips their HBM fetch (compute is skipped by pl.when).
    def kv_map(b, g, i, j):
        last = (i * bq + (bq - 1)) // bkv
        return (b, jnp.minimum(j, last), g)

    k_spec = pl.BlockSpec((1, bkv, hs), kv_map)
    v_spec = pl.BlockSpec((1, bkv, hs), kv_map)
    out_spec = pl.BlockSpec((1, bq, q_per_kv * hs), lambda b, g, i, j: (b, i, g))

    kernel = functools.partial(_flash_attention_kernel, scale=scale, q_per_kv=q_per_kv,
                               head_size=hs, block_q=bq, block_kv=bkv)
    return pl.pallas_call(
        kernel,
        out_shape=jax.ShapeDtypeStruct((B, T, n_query_groups * q_per_kv * hs), q.dtype),
        grid_spec=pltpu.PrefetchScalarGridSpec(
            num_scalar_prefetch=0,
            grid=grid,
            in_specs=[q_spec, k_spec, v_spec],
            out_specs=out_spec,
            scratch_shapes=[
                pltpu.VMEM((bq, q_per_kv * hs), q.dtype),       # scaled q (resident over kv loop)
                pltpu.VMEM((q_per_kv, bq, 1), jnp.float32),     # running max, per head
                pltpu.VMEM((q_per_kv, bq, 1), jnp.float32),     # running denom, per head
                pltpu.VMEM((q_per_kv, bq, hs), jnp.float32),    # output accumulator, per head
            ],
        ),
        compiler_params=pltpu.CompilerParams(
            dimension_semantics=("parallel", "parallel", "parallel", "arbitrary"),
            vmem_limit_bytes=VMEM_LIMIT_BYTES,
        ),
    )(q, k, v)


# ----------------------------------------------------------------------------- module forward
def causal_self_attention_forward(params, x, cos, sin, cfg):
    """Reproduces CausalSelfAttention.forward(x, cos, sin, mask=None, input_pos=None)."""
    B, T, C = x.shape
    n_head = cfg["n_head"]
    qg = cfg["n_query_groups"]
    hs = cfg["head_size"]
    q_per_kv = n_head // qg
    rope_n_elem = int(cfg["rotary_percentage"] * hs)
    compute_dtype = params["attn_w_t"].dtype      # bf16 (weights stored narrow for the MXU)

    xc = x.astype(compute_dtype)

    # 1) qkv = self.attn(x)  -- tiled MXU matmul (bf16 in, f32 accumulate)
    qkv = pallas_linear(xc.reshape(B * T, C), params["attn_w_t"], params["attn_b"],
                        block_m=cfg.get("linear_block_m", 512),
                        block_n=cfg.get("linear_block_n", 512),
                        block_k=cfg.get("linear_block_k", 512)).reshape(B, T, -1)

    # 2) RoPE + de-interleave pre-pass (replaces the XLA 5-D transpose/slices and hoists
    #    RoPE + cos/sin streaming out of the flash kernel entirely)
    q, k, v = pallas_rope_split(qkv, cos, sin, n_query_groups=qg, q_per_kv=q_per_kv,
                                head_size=hs, rope_n_elem=rope_n_elem,
                                block_t=cfg.get("rope_block_t", 512))

    # 3) flash attention: mask is None -> is_causal=True; softcapping None;
    #    scale = 1/sqrt(head_size); K/V reused across the GQA group.
    scale = 1.0 / math.sqrt(cfg["attention_scores_scalar"] or hs)
    y = pallas_flash_attention(q, k, v, scale=scale, n_query_groups=qg,
                               q_per_kv=q_per_kv, head_size=hs,
                               block_q=cfg.get("attn_block_q", 512),
                               block_kv=cfg.get("attn_block_kv", 256))

    # 4) output projection
    out = pallas_linear(y.reshape(B * T, n_head * hs), params["proj_w_t"], params["proj_b"],
                        block_m=cfg.get("linear_block_m", 512),
                        block_n=cfg.get("linear_block_n", 512),
                        block_k=cfg.get("linear_block_k", 512))
    out = out.reshape(B, T, cfg["n_embd"]).astype(x.dtype)

    # Aux outputs matching the torch module: post-RoPE q and GQA-broadcast post-RoPE k / v in
    # (B, n_head, T, head_size); mask stays None on the causal path. These pure-jnp views are
    # only materialized if the caller consumes them (dead-code eliminated under jit otherwise).
    q_aux = q.reshape(B, T, n_head, hs).transpose(0, 2, 1, 3).astype(x.dtype)
    k_aux = jnp.broadcast_to(k.reshape(B, T, qg, 1, hs), (B, T, qg, q_per_kv, hs)
                             ).reshape(B, T, n_head, hs).transpose(0, 2, 1, 3).astype(x.dtype)
    v_aux = jnp.broadcast_to(v.reshape(B, T, qg, 1, hs), (B, T, qg, q_per_kv, hs)
                             ).reshape(B, T, n_head, hs).transpose(0, 2, 1, 3).astype(x.dtype)
    # TODO(synk): kv-cache (input_pos), sliding-window attention and logit-softcapping branches
    # are not exercised here (module defaults: off).
    return out, [q_aux, k_aux, v_aux, None]


# ----------------------------------------------------------------------------- pure-JAX reference
def ref_forward(params, x, cos, sin, cfg):
    B, T, C = x.shape
    n_head, qg, hs = cfg["n_head"], cfg["n_query_groups"], cfg["head_size"]
    q_per_kv = n_head // qg
    rope_n_elem = int(cfg["rotary_percentage"] * hs)
    w_attn = params["attn_w_t"].astype(jnp.float32)
    w_proj = params["proj_w_t"].astype(jnp.float32)

    qkv = x @ w_attn + params["attn_b"]
    qkv = qkv.reshape(B, T, qg, q_per_kv + 2, hs)
    qkv = jnp.transpose(qkv, (0, 2, 3, 1, 4))
    q = qkv[:, :, :q_per_kv]
    k = jnp.broadcast_to(qkv[:, :, q_per_kv:q_per_kv + 1], (B, qg, q_per_kv, T, hs))
    v = jnp.broadcast_to(qkv[:, :, q_per_kv + 1:q_per_kv + 2], (B, qg, q_per_kv, T, hs))
    q = q.reshape(B, n_head, T, hs)
    k = k.reshape(B, n_head, T, hs)
    v = v.reshape(B, n_head, T, hs)

    def rope(x4):
        xr = x4[..., :rope_n_elem]
        half = rope_n_elem // 2
        rot = jnp.concatenate([-xr[..., half:], xr[..., :half]], axis=-1)
        roped = xr * cos + rot * sin
        return jnp.concatenate([roped, x4[..., rope_n_elem:]], axis=-1)

    q, k = rope(q), rope(k)
    scale = 1.0 / math.sqrt(cfg["attention_scores_scalar"] or hs)
    scores = jnp.einsum("bhqd,bhkd->bhqk", q, k) * scale
    causal = jnp.tril(jnp.ones((T, T), dtype=bool))
    scores = jnp.where(causal, scores, -jnp.inf)
    p = jax.nn.softmax(scores, axis=-1)
    y = jnp.einsum("bhqk,bhkd->bhqd", p, v)
    y = jnp.transpose(y, (0, 2, 1, 3)).reshape(B, T, n_head * hs)
    return y @ w_proj + params["proj_b"]


# ----------------------------------------------------------------------------- main
if __name__ == "__main__":
    cfg = dict(
        n_embd=256,
        n_head=4,
        n_query_groups=2,        # GQA: q_per_kv = 2 -> K/V reuse inside the group
        head_size=128,           # lane-dense per-head tiles (128 = vreg lane width)
        rotary_percentage=1.0,   # RoPE over the full head
        bias=True,
        attention_scores_scalar=None,
        attention_logit_softcapping=None,
        sliding_window_size=None,
        # small tiles so the test exercises the K-accumulation loop, the kv loop, the
        # causal DMA clamp and the interior/diagonal mask split (production defaults
        # would be 256/512-sized tiles)
        attn_block_q=64,
        attn_block_kv=64,
        rope_block_t=64,
        linear_block_m=128,
        linear_block_n=256,
        linear_block_k=128,
    )
    B, T = 2, 128
    qkv_out = (cfg["n_head"] + 2 * cfg["n_query_groups"]) * cfg["head_size"]   # 1024
    proj_in = cfg["n_head"] * cfg["head_size"]                                 # 512
    rope_n_elem = int(cfg["rotary_percentage"] * cfg["head_size"])             # 128

    key = jax.random.PRNGKey(0)
    k1, k2, k3, k4, k5 = jax.random.split(key, 5)
    params = {
        # weights stored PRE-TRANSPOSED to (in, out) and in bf16 to feed the MXU narrow
        "attn_w_t": (0.02 * jax.random.normal(k1, (qkv_out, cfg["n_embd"]), jnp.float32)).T
                     .astype(jnp.bfloat16),
        "attn_b": 0.02 * jax.random.normal(k2, (qkv_out,), jnp.float32),
        "proj_w_t": (0.02 * jax.random.normal(k3, (cfg["n_embd"], proj_in), jnp.float32)).T
                     .astype(jnp.bfloat16),
        "proj_b": 0.02 * jax.random.normal(k4, (cfg["n_embd"],), jnp.float32),
    }
    x = jax.random.normal(k5, (B, T, cfg["n_embd"]), jnp.float32)

    # rope cache (litgpt-style)
    inv_freq = 1.0 / (10000.0 ** (jnp.arange(0, rope_n_elem, 2, dtype=jnp.float32) / rope_n_elem))
    freqs = jnp.outer(jnp.arange(T, dtype=jnp.float32), inv_freq)
    emb = jnp.concatenate([freqs, freqs], axis=-1)                             # (T, rope_n_elem)
    cos, sin = jnp.cos(emb), jnp.sin(emb)

    out, (q_aux, k_aux, v_aux, mask) = causal_self_attention_forward(params, x, cos, sin, cfg)
    out = jax.block_until_ready(out)

    ref = ref_forward(params, x, cos, sin, cfg)
    assert out.shape == (B, T, cfg["n_embd"])
    max_err = float(jnp.max(jnp.abs(out.astype(jnp.float32) - ref)))
    # tolerance covers the bf16 MXU path (f32 accumulation), the EUP approximate reciprocal
    # and flash-attention accumulation-order differences
    assert jnp.allclose(out.astype(jnp.float32), ref, atol=2e-2, rtol=2e-2), \
        f"mismatch vs reference, max abs err {max_err}"
    print("KERNEL_OK")
</pallas_src>

<mosaic_0001>
module attributes {stable_mosaic.version = 11 : i64} {
  func.func @_linear_kernel(%arg0: i32, %arg1: i32, %arg2: i32, %arg3: memref<128x128xbf16, #tpu.memory_space<vmem>>, %arg4: memref<128x256xbf16, #tpu.memory_space<vmem>>, %arg5: memref<1x256xf32, #tpu.memory_space<vmem>>, %arg6: memref<128x256xbf16, #tpu.memory_space<vmem>>, %arg7: memref<128x256xf32, #tpu.memory_space<vmem>>) attributes {dimension_semantics = [#tpu.dimension_semantics<parallel>, #tpu.dimension_semantics<parallel>, #tpu.dimension_semantics<arbitrary>], iteration_bounds = array<i64: 2, 4, 2>, scalar_prefetch = 0 : i64, scratch_operands = 1 : i64, tpu.core_type = #tpu.core_type<tc>, window_params = [{transform_indices = @transform_0, window_bounds = array<i64: 128, 128>}, {transform_indices = @transform_1, window_bounds = array<i64: 128, 256>}, {transform_indices = @transform_2, window_bounds = array<i64: 1, 256>}, {transform_indices = @transform_3, window_bounds = array<i64: 128, 256>}]} {
    %c0_i32 = arith.constant 0 : i32
    %0 = arith.cmpi eq, %arg2, %c0_i32 : i32
    %1 = arith.extui %0 : i1 to i32
    %c0_i32_0 = arith.constant 0 : i32
    %2 = arith.cmpi ne, %1, %c0_i32_0 : i32
    scf.if %2 {
      %cst_9 = arith.constant 0.000000e+00 : f32
      %12 = vector.broadcast %cst_9 : f32 to vector<128x256xf32>
      %c0_10 = arith.constant 0 : index
      %c0_11 = arith.constant 0 : index
      %13 = vector.load %arg7[%c0_10, %c0_11] : memref<128x256xf32, #tpu.memory_space<vmem>>, vector<128x256xf32>
      tpu.vector_store %arg7[%c0_10, %c0_11], %12 {strides = array<i32>} : memref<128x256xf32, #tpu.memory_space<vmem>>, vector<128x256xf32>,
    } else {
    }
    %c0 = arith.constant 0 : index
    %c0_1 = arith.constant 0 : index
    %3 = vector.load %arg7[%c0, %c0_1] : memref<128x256xf32, #tpu.memory_space<vmem>>, vector<128x256xf32>
    %c0_2 = arith.constant 0 : index
    %c0_3 = arith.constant 0 : index
    %4 = vector.load %arg3[%c0_2, %c0_3] : memref<128x128xbf16, #tpu.memory_space<vmem>>, vector<128x128xbf16>
    %c0_4 = arith.constant 0 : index
    %c0_5 = arith.constant 0 : index
    %5 = vector.load %arg4[%c0_4, %c0_5] : memref<128x256xbf16, #tpu.memory_space<vmem>>, vector<128x256xbf16>
    %cst = arith.constant dense<0.000000e+00> : vector<128x256xf32>
    %6 = tpu.matmul %4, %5, %cst {dimension_numbers = #tpu.dot_dimension_numbers<[1], [0], [0], [1], [0, 0, 1, 1], [], []>} : vector<128x128xbf16>, vector<128x256xbf16>, vector<128x256xf32> -> vector<128x256xf32>
    %7 = arith.addf %3, %6 : vector<128x256xf32>
    %c0_6 = arith.constant 0 : index
    %c0_7 = arith.constant 0 : index
    %8 = vector.load %arg7[%c0_6, %c0_7] : memref<128x256xf32, #tpu.memory_space<vmem>>, vector<128x256xf32>
    tpu.vector_store %arg7[%c0_6, %c0_7], %7 {strides = array<i32>} : memref<128x256xf32, #tpu.memory_space<vmem>>, vector<128x256xf32>,
    %c1_i32 = arith.constant 1 : i32
    %9 = arith.cmpi eq, %arg2, %c1_i32 : i32
    %10 = arith.extui %9 : i1 to i32
    %c0_i32_8 = arith.constant 0 : i32
    %11 = arith.cmpi ne, %10, %c0_i32_8 : i32
    scf.if %11 {
      %c0_9 = arith.constant 0 : index
      %c0_10 = arith.constant 0 : index
      %12 = vector.load %arg7[%c0_9, %c0_10] : memref<128x256xf32, #tpu.memory_space<vmem>>, vector<128x256xf32>
      %c0_11 = arith.constant 0 : index
      %c0_12 = arith.constant 0 : index
      %13 = vector.load %arg5[%c0_11, %c0_12] : memref<1x256xf32, #tpu.memory_space<vmem>>, vector<1x256xf32>
      %14 = vector.broadcast %13 : vector<1x256xf32> to vector<128x256xf32>
      %15 = arith.addf %12, %14 : vector<128x256xf32>
      %16 = arith.truncf %15 : vector<128x256xf32> to vector<128x256xbf16>
      %c0_13 = arith.constant 0 : index
      %c0_14 = arith.constant 0 : index
      %17 = vector.load %arg6[%c0_13, %c0_14] : memref<128x256xbf16, #tpu.memory_space<vmem>>, vector<128x256xbf16>
      tpu.vector_store %arg6[%c0_13, %c0_14], %16 {strides = array<i32>} : memref<128x256xbf16, #tpu.memory_space<vmem>>, vector<128x256xbf16>,
    } else {
    }
    return
  }
  func.func @transform_0(%arg0: i32, %arg1: i32, %arg2: i32) -> (i32, i32) {
    %c0_i32 = arith.constant 0 : i32
    return %arg0, %arg2 : i32, i32
  }
  func.func @transform_1(%arg0: i32, %arg1: i32, %arg2: i32) -> (i32, i32) {
    %c0_i32 = arith.constant 0 : i32
    return %arg2, %arg1 : i32, i32
  }
  func.func @transform_2(%arg0: i32, %arg1: i32, %arg2: i32) -> (i32, i32) {
    %c0_i32 = arith.constant 0 : i32
    %c0_i32_0 = arith.constant 0 : i32
    return %c0_i32, %arg1 : i32, i32
  }
  func.func @transform_3(%arg0: i32, %arg1: i32, %arg2: i32) -> (i32, i32) {
    %c0_i32 = arith.constant 0 : i32
    return %arg0, %arg1 : i32, i32
  }
}

</mosaic_0001>

<bundles_post_ra>
// kernel: tpu_custom_call.1
= control target key start
LH: loop header
LB: loop body
LE: loop exit
PB: predicated region body
PF: predicated region fallthrough
CT: control target
= control target key end

     0   :  { %s2098_s0 = inlined_call_operand.hbm [shape: bf16[256,256], index: 0, kind: input, shape index: {}]   ;;  %s2099_s1 = inlined_call_operand.hbm [shape: bf16[256,1024], index: 1, kind: input, shape index: {}]   ;;  %s2100_s2 = inlined_call_operand.hbm [shape: f32[1,1024], index: 2, kind: input, shape index: {}]   ;;  %s2101_s3 = inlined_call_operand.hbm [shape: bf16[256,1024], index: 3, kind: output, shape index: {}]  }
   0x1   :  { %2116 = sst [smem:[#allocation30_spill]] %s2098_s0 }
   0x2   :  { %2117 = sst [smem:[#allocation31_spill]] %s2099_s1 }
   0x3   :  { %2118 = sst [smem:[#allocation32_spill]] %s2100_s2 }
   0x4   :  { %2119 = sst [smem:[#allocation33_spill]] %s2101_s3 }
   0x5   :  { %8 = vsyncpa [#allocation4], 0 }
   0x6   :  { %10 = vsyncpa [#allocation4 + $0x1], 0 }
   0x7   :  { %11 = vsyncpa [#allocation7], 0 }
   0x8   :  { %13 = vsyncpa [#allocation7 + $0x1], 0 }
   0x9   :  { %14 = vsyncpa [#allocation5], 0 }
   0xa   :  { %16 = vsyncpa [#allocation5 + $0x1], 0  ;;  %s1629_s12 = smov 0   ;;  %s1631_s13 = smov 0  }
   0xb   :  { %s1633_s14 = smov 0   ;;  %s1635_s15 = smov 0  }
   0xc   :  { %s1637_s16 = smov 0   ;;  %s1639_s17 = smov 0  }
   0xd   :  { %s1641_s18 = smov 0   ;;  %s1643_s19 = smov 0  }
   0xe   :  { %s1645_s20 = smov 0   ;;  %s1647_s21 = smov 0  }
   0xf   :  { %s1649_s22 = smov 0   ;;  %s1651_s23 = smov 0  }
  0x10   :  { %s1653_s24 = smov 0   ;;  %s1655_s25 = smov 0  }
  0x11   :  { %s1657_s26 = smov 0   ;;  %s1659_s27 = smov 0  }
  0x12   :  { %s1661_s28 = smov 0   ;;  %s1663_s29 = smov 0  }
  0x13   :  { %s1665_s30 = smov 0  }
  0x14 LB: > { %2120 = sst [smem:[#allocation14_spill]] %s1526_s12  ;;  %s34_s4 = sadd.s32 1, %s1586_s27  ;;  %s1598_s30 = sphi %s1665_s30, %s22_s30   ;;  %s1594_s29 = sphi %s1663_s29, %s2174_s29   ;;  %s1590_s28 = sphi %s1661_s28, %s2188_s28   ;;  %s1586_s27 = sphi %s1659_s27, %s2187_s27   ;;  %s1582_s26 = sphi %s1657_s26, %s2170_s26   ;;  %s1578_s25 = sphi %s1655_s25, %s2186_s25   ;;  %s1574_s24 = sphi %s1653_s24, %s2185_s24   ;;  %s1570_s23 = sphi %s1651_s23, %s2184_s23   ;;  %s1566_s22 = sphi %s1649_s22, %s2183_s22   ;;  %s1562_s21 = sphi %s1647_s21, %s2182_s21   ;;  %s1558_s20 = sphi %s1645_s20, %s2167_s20   ;;  %s1554_s19 = sphi %s1643_s19, %s2181_s19   ;;  %s1550_s18 = sphi %s1641_s18, %s2180_s18   ;;  %s1546_s17 = sphi %s1639_s17, %s2179_s17   ;;  %s1542_s16 = sphi %s1637_s16, %s2178_s16   ;;  %s1538_s15 = sphi %s1635_s15, %s2176_s15   ;;  %s1534_s14 = sphi %s1633_s14, %s2175_s14   ;;  %s1530_s13 = sphi %s1631_s13, %s2173_s13   ;;  %s1526_s12 = sphi %s1629_s12, %s2165_s12  }
  0x15   : > { %2121 = sst [smem:[#allocation15_spill]] %s1530_s13  ;;  %s37_s5 = sadd.s32 1, %s1590_s28 }
  0x16   : > { %2122 = sst [smem:[#allocation16_spill]] %s1538_s15  ;;  %p35_p0 = scmp.ge.s32.totalorder %s34_s4, 2 }
  0x17   : > { %2123 = sst [smem:[#allocation17_spill]] %s1558_s20  ;;  %p58_p1 = scmp.eq.s32.totalorder %s1598_s30, 0 }
  0x18   : > { %2124 = sst [smem:[#allocation18_spill]] %s1574_s24  ;;  %s78_s6 = sadd.s32 1, %s1558_s20 }
  0x19   : > { %2125 = sst [smem:[#allocation19_spill]] %s1578_s25  ;;  %p85_p2 = scmp.ne.s32.totalorder %s1558_s20, %s1554_s19 }
  0x1a   : > { %2126 = sst [smem:[#allocation20_spill]] %s1582_s26  ;;  %s2190_s4 = smov (%p35_p0, %s34_s4), 0 }
  0x1b   : > { %2127 = sst [smem:[#allocation21_spill]] %s1586_s27  ;;  %s2192_s5 = smov (!%p35_p0, %s37_s5), %s1590_s28 }
  0x1c   : > { %2128 = sst [smem:[#allocation22_spill]] %s1594_s29  ;;  %s1737_s7 = ssub.s32 %s1586_s27, %s2190_s4 }
  0x1d   : > { %2129 = sst [smem:[#allocation23_spill]] %s2190_s4  ;;  %p1741_p3 = por %p85_p2, %p58_p1 }
  0x1e   : > { %p39_p4 = scmp.ge.s32.totalorder %s2192_s5, 4  ;;  %p91_p5 = scmp.ne.s32.totalorder %s1554_s19, %s1550_s18 }
  0x1f   : > { %p2113_p6 = scmp.lt.s32.totalorder %s1598_s30, 16  ;;  %s193_s10 = sand.u32 1, %s1598_s30  }
  0x20   : > { %s1752_s9 = scalar_select %p39_p4, 0, %s2192_s5  }
  0x21   : > { %s195_s3 = sand.u32 1, %s1558_s20   ;;  %s2107_s25 = sshll.u32 %s1590_s28, 1 }
  0x22   : > { %2131 = sst [smem:[#allocation24_spill]] %s1752_s9  ;;  %s1757_s11 = ssub.s32 %s1590_s28, %s1752_s9 }
  0x23   : > { %s75_s4 = sor.u32 %s1757_s11, %s1737_s7  ;;  %s969_s26 = sshll.u32 %s195_s3, 7 }
  0x24   : > { %p76_p7 = scmp.eq.s32.totalorder %s75_s4, 0  ;;  %s1087_s2 = sshll.u32 %s1586_s27, 7 }
  0x25   : > { %s197_s12 = scalar_lea.vmem [#allocation6], %s969_s26  ;;  %s203_s15 = sadd.s32 %s1087_s2, %s2107_s25 }
  0x26   : > { %s1764_s24 = scalar_select %p76_p7, %s1558_s20, %s78_s6  }
  0x27   : > { %s208_s13 = sshll.u32 %s197_s12, 4  ;;  %s973_s9 = sshll.u32 %s203_s15, 2  ;;  %s209_s13 = int_to_ptr.vmem [resolvable:$true] %s208_s13 }
  0x28   : > { %2132 = sst [smem:[#allocation25_spill]] %s1764_s24  ;;  %p1141_p8 = pnand %p2113_p6, %p1741_p3 }
  0x29   : > { %s2133_s1 = sld [smem:[#allocation31_spill]]  ;;  %s1776_s2 = scalar_lea.sflag [#allocation7], %s193_s10 }
  0x2a   : > { %2134 = sst [smem:[#allocation26_spill]] %s1776_s2  ;;  %s1600_s26 = smov 512  }
  0x2b   : > { %s2108_s15 = smov 128   ;;  %s1602_s8 = smov 8  }
  0x2c   : > { %p976_p9 = scmp.ge.s32.totalorder %s1598_s30, 1  ;;  %p235_p10 = scmp.lt.s32.totalorder %s1598_s30, 17 }
  0x2d   : > { %s41_s3 = sadd.s32 1, %s1594_s29  ;;  %s50_s10 = sadd.s32 1, %s1570_s23 }
  0x2e   : > { %p1782_p11 = pnand %p976_p9, %p235_p10  ;;  %s2194_s3 = smov (!%p39_p4, %s41_s3), %s1594_s29 }
  0x2f   : > { %s205_s6 = scalar_lea.hbm %s2133_s1, %s973_s9  ;;  %p57_p12 = scmp.ne.s32.totalorder %s1570_s23, %s1566_s22 }
  0x30   : > { %s206_s12 = sshll.u32 %s205_s6, 4  ;;  %p43_p13 = scmp.ge.s32.totalorder %s2194_s3, 2  ;;  %s207_s12 = int_to_ptr.hbm [resolvable:$true] %s206_s12 }
  0x31   : > { %1143 = dma.hbm_to_vmem [thread:$0]  (!%p1141_p8), %s207_s12, 2048, %s209_s13, %s1776_s2, %s1600_s26, %s2108_s15, %s1602_s8  }
  0x32   : > { %s2135_s9 = scalar_select %p1782_p11, 1, 0 }
  0x33   : > { %p63_p0 = scmp.ne.s32.totalorder %s1566_s22, %s1562_s21  ;;  %p1797_p2 = por %p58_p1, %p57_p12 }
  0x34   : > { %2136 = sst [smem:[#allocation27_spill]] %s2135_s9  ;;  %s132_s4 = sadd.s32 1, %s1534_s14 }
  0x35   : > { %s2196_s3 = smov (%p43_p13, %s2194_s3), 0  ;;  %s169_s6 = sand.u32 1, %s1570_s23  }
  0x36   : > { %2138 = sst [smem:[#allocation28_spill]] %s2196_s3  ;;  %s1086_s12 = sshll.u32 %s1594_s29, 5 }
  0x37   : > { %s45_s5 = ssub.s32 %s1594_s29, %s2196_s3  ;;  %s965_s25 = sshll.u32 %s169_s6, 6 }
  0x38   : > { %s47_s26 = sor.u32 %s1737_s7, %s45_s5  ;;  %s129_s8 = sor.u32 %s1757_s11, %s45_s5 }
  0x39   : > { %p48_p3 = scmp.eq.s32.totalorder %s47_s26, 0  ;;  %p130_p4 = scmp.eq.s32.totalorder %s129_s8, 0 }
  0x3a   : > { %s178_s15 = sadd.s32 %s1586_s27, %s1086_s12  ;;  %s2140_s0 = sld [smem:[#allocation30_spill]] }
  0x3b   : > { %s1812_s1 = scalar_select %p48_p3, %s1570_s23, %s50_s10  }
  0x3c   : > { %s1815_s24 = scalar_select %p130_p4, %s1534_s14, %s132_s4  }
  0x3d   : > { %2139 = sst [smem:[#allocation29_spill]] %s1812_s1  ;;  %s968_s20 = sshll.u32 %s178_s15, 2 }
  0x3e   : > { %s173_s7 = scalar_lea.vmem [#allocation3], %s965_s25  ;;  %s2141_s10 = sld [smem:[#allocation16_spill]] }
  0x3f   : > { %s183_s5 = sshll.u32 %s173_s7, 4  ;;  %s2142_s15 = sld [smem:[#allocation15_spill]]  ;;  %s184_s5 = int_to_ptr.vmem [resolvable:$true] %s183_s5 }
  0x40   : > { %s180_s3 = scalar_lea.hbm %s2140_s0, %s968_s20  ;;  %p1138_p7 = pnand %p2113_p6, %p1797_p2 }
  0x41   : > { %s181_s12 = sshll.u32 %s180_s3, 4  ;;  %s170_s20 = scalar_lea.sflag [#allocation4], %s169_s6  ;;  %s182_s12 = int_to_ptr.hbm [resolvable:$true] %s181_s12 }
  0x42   : > { %s1603_s2 = smov 64   ;;  %s1604_s25 = smov 4  }
  0x43   : > { %s2143_s9 = smov 128   ;;  %s2144_s4 = sld [smem:[#allocation14_spill]] }
  0x44   : > { %1140 = dma.hbm_to_vmem [thread:$0]  (!%p1138_p7), %s182_s12, 1024, %s184_s5, %s170_s20, %s2143_s9, %s1603_s2, %s1604_s25  }
  0x45   : > { %s1826_s3 = sadd.s32 4294967295, %s1598_s30   ;;  %s962_s26 = sadd.s32 4294967294, %s1598_s30  }
  0x46   : > { %p64_p8 = scmp.eq.s32.totalorder %s1826_s3, 0  ;;  %p102_p9 = scmp.eq.s32.totalorder %s1757_s11, 0 }
  0x47   : > { %s104_s13 = sadd.s32 1, %s1546_s17  ;;  %p111_p13 = scmp.ne.s32.totalorder %s1546_s17, %s1542_s16 }
  0x48   : > { %p1835_p10 = por %p64_p8, %p63_p0  ;;  %p1842_p12 = por %p91_p5, %p64_p8 }
  0x49   : > { %s1847_s7 = scalar_select %p102_p9, %s1546_s17, %s104_s13  }
  0x4a   : > { %p117_p2 = scmp.ne.s32.totalorder %s1542_s16, %s2141_s10  ;;  %p142_p3 = scmp.ne.s32.totalorder %s1534_s14, %s2142_s15 }
  0x4b   : > { %p143_p4 = scmp.eq.s32.totalorder %s1826_s3, 15  ;;  %s2147_s11 = sld [smem:[#allocation26_spill]] }
  0x4c   : > { %p1858_p7 = por %p111_p13, %p58_p1  ;;  %p1862_p0 = por %p117_p2, %p64_p8 }
  0x4d   : > { %p1866_p5 = por %p143_p4, %p142_p3  ;;  %p148_p9 = scmp.ne.s32.totalorder %s2142_s15, %s2144_s4 }
  0x4e   : > { %p149_p6 = scmp.eq.s32.totalorder %s962_s26, 15  ;;  %s220_s12 = sand.u32 1, %s1546_s17  }
  0x4f   : > { %s974_s10 = sshll.u32 %s220_s12, 1  ;;  %s2151_s20 = sshll.u32 %s1590_s28, 1 }
  0x50   : > { %s2152_s9 = sld [smem:[#allocation32_spill]]  ;;  %p1878_p1 = por %p149_p6, %p148_p9 }
  0x51   : > { %s222_s27 = scalar_lea.vmem [#allocation8], %s974_s10  ;;  %p2154_p8 = scmp.lt.s32.totalorder %s1598_s30, 16 }
  0x52   : > { %s230_s1 = sshll.u32 %s222_s27, 4  ;;  %s241_s4 = sand.u32 (!%p1782_p11), 1, %s1566_s22   ;;  %s231_s1 = int_to_ptr.vmem [resolvable:$true] %s230_s1 }
  0x53   : > { %p1144_p13 = pnand %p2154_p8, %p1858_p7  ;;  %s977_s26 = sshll.u32 (!%p1782_p11), %s241_s4, 6 }
  0x54   : > { %239 = sbr.rel (%p1782_p11) target bundleno = 421 (0x1a5), region = 32  ;;  %s242_s12 = scalar_lea.sflag (!%p1782_p11), [#allocation4], %s241_s4 }
  0x56   : > { %s226_s13 = scalar_lea.hbm %s2152_s9, %s2151_s20  ;;  %s1890_s20 = scalar_lea.vmem (!%p1782_p11), [#allocation3], %s977_s26 }
  0x57   : > { %s228_s29 = sshll.u32 %s226_s13, 4  ;;  %s229_s29 = int_to_ptr.hbm [resolvable:$true] %s228_s29 }
  0x58   : > { %1146 = dma.hbm_to_vmem [thread:$0]  (!%p1144_p13), %s229_s29, 32, %s231_s1, %s2147_s11  }
  0x59   : > { %1509 = dma.done.wait (%p1835_p10), %s242_s12, 1024  }
  0x5a   : > { %1511 = vsyncadd (%p1835_p10), %s242_s12, 4294966272  ;;  %s251_s27 = sand.u32 1, %s1826_s3   ;;  %s253_s1 = sand.u32 1, %s1554_s19  }
  0x5b   : > { %s978_s29 = sshll.u32 %s253_s1, 7  ;;  %s252_s11 = scalar_lea.sflag [#allocation7], %s251_s27 }
  0x5c   : > { %s1898_s21 = scalar_lea.vmem [#allocation6], %s978_s29 }
  0x5d   : > { %1513 = dma.done.wait (%p1842_p12), %s252_s11, 2048  }
  0x5e   : > { %1515 = vsyncadd (%p1842_p12), %s252_s11, 4294965248  ;;  %s263_s10 = sand.u32 1, %s1542_s16  }
  0x5f   : > { %s1905_s2 = sshll.u32 %s263_s10, 1 }
  0x60   : > { %s265_s6 = scalar_lea.vmem [#allocation8], %s1905_s2 }
  0x61   : > { %1517 = dma.done.wait (%p1862_p0), %s252_s11, 32  }
  0x62   : > { %1519 = vsyncadd (%p1862_p0), %s252_s11, 4294967264  ;;  %s2156_s3 = sld [smem:[#allocation15_spill]] }
  0x63   : > { %s2157_s8 = sld [smem:[#allocation18_spill]] }
  0x68   : > { %s296_s25 = sand.u32 1, %s2156_s3  }
  0x69   : > { %s980_s9 = sshll.u32 %s296_s25, 7  ;;  %p981_p6 = scmp.ne.s32.totalorder %s2157_s8, 0 }
  0x6a   : > { %s1915_s13 = scalar_lea.vmem [#allocation9], %s980_s9 }
  0x6b   : > { %308 = sbr.rel (%p981_p6) target bundleno = 145 (0x91), region = 48 }
  0x70   : > { %v1605_v0 = vmov 0.0  }
  0x71   : > { %309 = vst [vmem:[#allocation2 + $0xb0] sm:$0xff] %v1605_v0 }
  0x72   : > { %310 = vst [vmem:[#allocation2] sm:$0xff] %v1605_v0 }
  0x73   : > { %311 = vst [vmem:[#allocation2 + $0xd8] sm:$0xff] %v1605_v0 }
  0x74   : > { %312 = vst [vmem:[#allocation2 + $0x18] sm:$0xff] %v1605_v0 }
  0x75   : > { %313 = vst [vmem:[#allocation2 + $0x50] sm:$0xff] %v1605_v0 }
  0x76   : > { %314 = vst [vmem:[#allocation2 + $0x68] sm:$0xff] %v1605_v0 }
  0x77   : > { %315 = vst [vmem:[#allocation2 + $0x30] sm:$0xff] %v1605_v0 }
  0x78   : > { %316 = vst [vmem:[#allocation2 + $0x48] sm:$0xff] %v1605_v0 }
  0x79   : > { %317 = vst [vmem:[#allocation2 + $0x80] sm:$0xff] %v1605_v0 }
  0x7a   : > { %318 = vst [vmem:[#allocation2 + $0x88] sm:$0xff] %v1605_v0 }
  0x7b   : > { %319 = vst [vmem:[#allocation2 + $0xe8] sm:$0xff] %v1605_v0 }
  0x7c   : > { %320 = vst [vmem:[#allocation2 + $0xb8] sm:$0xff] %v1605_v0 }
  0x7d   : > { %321 = vst [vmem:[#allocation2 + $0x60] sm:$0xff] %v1605_v0 }
  0x7e   : > { %322 = vst [vmem:[#allocation2 + $0xf0] sm:$0xff] %v1605_v0 }
  0x7f   : > { %323 = vst [vmem:[#allocation2 + $0x8] sm:$0xff] %v1605_v0 }
  0x80   : > { %324 = vst [vmem:[#allocation2 + $0x78] sm:$0xff] %v1605_v0 }
  0x81   : > { %325 = vst [vmem:[#allocation2 + $0x38] sm:$0xff] %v1605_v0 }
  0x82   : > { %326 = vst [vmem:[#allocation2 + $0x58] sm:$0xff] %v1605_v0 }
  0x83   : > { %327 = vst [vmem:[#allocation2 + $0x40] sm:$0xff] %v1605_v0 }
  0x84   : > { %328 = vst [vmem:[#allocation2 + $0xc8] sm:$0xff] %v1605_v0 }
  0x85   : > { %329 = vst [vmem:[#allocation2 + $0xe0] sm:$0xff] %v1605_v0 }
  0x86   : > { %330 = vst [vmem:[#allocation2 + $0x90] sm:$0xff] %v1605_v0 }
  0x87   : > { %331 = vst [vmem:[#allocation2 + $0x70] sm:$0xff] %v1605_v0 }
  0x88   : > { %332 = vst [vmem:[#allocation2 + $0xc0] sm:$0xff] %v1605_v0 }
  0x89   : > { %333 = vst [vmem:[#allocation2 + $0xa8] sm:$0xff] %v1605_v0 }
  0x8a   : > { %334 = vst [vmem:[#allocation2 + $0xd0] sm:$0xff] %v1605_v0 }
  0x8b   : > { %335 = vst [vmem:[#allocation2 + $0x10] sm:$0xff] %v1605_v0 }
  0x8c   : > { %336 = vst [vmem:[#allocation2 + $0x28] sm:$0xff] %v1605_v0 }
  0x8d   : > { %337 = vst [vmem:[#allocation2 + $0xa0] sm:$0xff] %v1605_v0 }
  0x8e   : > { %338 = vst [vmem:[#allocation2 + $0xf8] sm:$0xff] %v1605_v0 }
  0x8f   : > { %339 = vst [vmem:[#allocation2 + $0x20] sm:$0xff] %v1605_v0 }
  0x90   : > { %340 = vst [vmem:[#allocation2 + $0x98] sm:$0xff] %v1605_v0 }
  0x91 PF: > { %v1072_v1 = vld [vmem:[%s1898_s21 + $0x70] sm:$0xf]  ;;  %v1111_v2 = vld [vmem:[%s1898_s21 + $0x74] sm:$0xf0]  ;;  %v1110_v3 = vld [vmem:[%s1898_s21 + $0x74] sm:$0xf] }
  0x92   : > { %v1073_v4 = vor.u32 %v1111_v2, %v1072_v1  ;;  %v1074_v5 = vld [vmem:[%s1898_s21 + $0x78] sm:$0xf0]  ;;  %v1064_v6 = vld [vmem:[%s1898_s21 + $0x60] sm:$0xf]  ;;  %v1109_v7 = vld [vmem:[%s1898_s21 + $0x64] sm:$0xf0] }
  0x93   : > { %v1077_v8 = vor.u32 %v1110_v3, %v1074_v5  ;;  %v1108_v9 = vld [vmem:[%s1898_s21 + $0x64] sm:$0xf]  ;;  %v1066_v10 = vld [vmem:[%s1898_s21 + $0x68] sm:$0xf0]  ;;  %v1065_v11 = vor.u32 %v1109_v7, %v1064_v6  ;;  %v1056_v13 = vld [vmem:[%s1898_s21 + $0x50] sm:$0xf] }
  0x94   : > { %533 = vmatpush.bf16.msra.mxu0 %v1073_v4  ;;  %1113 = vmatpush.bf16.msra.mxu2 %v1073_v4  ;;  %v1069_v12 = vor.u32 %v1108_v9, %v1066_v10  ;;  %v1107_v14 = vld [vmem:[%s1898_s21 + $0x54] sm:$0xf0]  ;;  %v1106_v15 = vld [vmem:[%s1898_s21 + $0x54] sm:$0xf]  ;;  %v1058_v16 = vld [vmem:[%s1898_s21 + $0x58] sm:$0xf0] }
  0x95   : > { %582 = vmatpush.bf16.msra.mxu1 %v1077_v8  ;;  %1121 = vmatpush.bf16.msra.mxu3 %v1077_v8  ;;  %v1057_v17 = vor.u32 %v1107_v14, %v1056_v13  ;;  %v1061_v18 = vor.u32 %v1106_v15, %v1058_v16  ;;  %v1048_v19 = vld [vmem:[%s1898_s21 + $0x40] sm:$0xf]  ;;  %v1105_v20 = vld [vmem:[%s1898_s21 + $0x44] sm:$0xf0]  ;;  %v1104_v21 = vld [vmem:[%s1898_s21 + $0x44] sm:$0xf] }
  0x96   : > { %v1050_v22 = vld [vmem:[%s1898_s21 + $0x48] sm:$0xf0]  ;;  %v1049_v23 = vor.u32 %v1105_v20, %v1048_v19  ;;  %v1040_v25 = vld [vmem:[%s1898_s21 + $0x30] sm:$0xf]  ;;  %v1103_v26 = vld [vmem:[%s1898_s21 + $0x34] sm:$0xf0] }
  0x97   : > { %v1053_v24 = vor.u32 %v1104_v21, %v1050_v22  ;;  %v1102_v27 = vld [vmem:[%s1898_s21 + $0x34] sm:$0xf]  ;;  %v1042_v28 = vld [vmem:[%s1898_s21 + $0x38] sm:$0xf0]  ;;  %v1041_v29 = vor.u32 %v1103_v26, %v1040_v25  ;;  %v1032_v31 = vld [vmem:[%s1898_s21 + $0x20] sm:$0xf] }
  0x98   : > { %534 = vmatpush.bf16.msra.mxu0 %v1065_v11  ;;  %1114 = vmatpush.bf16.msra.mxu2 %v1065_v11  ;;  %v1045_v30 = vor.u32 %v1102_v27, %v1042_v28  ;;  %v1101_v32 = vld [vmem:[%s1898_s21 + $0x24] sm:$0xf0]  ;;  %v1100_v33 = vld [vmem:[%s1898_s21 + $0x24] sm:$0xf]  ;;  %v1034_v34 = vld [vmem:[%s1898_s21 + $0x28] sm:$0xf0] }
  0x99   : > { %583 = vmatpush.bf16.msra.mxu1 %v1069_v12  ;;  %1122 = vmatpush.bf16.msra.mxu3 %v1069_v12  ;;  %v1033_v35 = vor.u32 %v1101_v32, %v1032_v31  ;;  %v1037_v36 = vor.u32 %v1100_v33, %v1034_v34  ;;  %v1024_v37 = vld [vmem:[%s1898_s21 + $0x10] sm:$0xf]  ;;  %v1099_v38 = vld [vmem:[%s1898_s21 + $0x14] sm:$0xf0]  ;;  %v1098_v39 = vld [vmem:[%s1898_s21 + $0x14] sm:$0xf] }
  0x9a   : > { %v1026_v40 = vld [vmem:[%s1898_s21 + $0x18] sm:$0xf0]  ;;  %v1025_v41 = vor.u32 %v1099_v38, %v1024_v37  ;;  %v1016_v43 = vld [vmem:[%s1898_s21] sm:$0xf]  ;;  %v1097_v44 = vld [vmem:[%s1898_s21 + $0x4] sm:$0xf0] }
  0x9b   : > { %v1029_v42 = vor.u32 %v1098_v39, %v1026_v40  ;;  %v1096_v45 = vld [vmem:[%s1898_s21 + $0x4] sm:$0xf]  ;;  %v1018_v46 = vld [vmem:[%s1898_s21 + $0x8] sm:$0xf0]  ;;  %v1017_v47 = vor.u32 %v1097_v44, %v1016_v43  ;;  %v1090_v53 = vld [vmem:[%s1890_s20 + $0x10] sm:$0xff]  ;;  %s2158_s18 = sld [smem:[#allocation18_spill]] }
  0x9c   : > { %535 = vmatpush.bf16.msra.mxu0 %v1057_v17  ;;  %1115 = vmatpush.bf16.msra.mxu2 %v1057_v17  ;;  %v1021_v48 = vor.u32 %v1096_v45, %v1018_v46  ;;  %v1088_v49 = vld [vmem:[%s1890_s20] sm:$0xff]  ;;  %v1089_v51 = vld [vmem:[%s1890_s20 + $0x8] sm:$0xff]  ;;  %v1094_v54 = vld [vmem:[%s1890_s20 + $0x30] sm:$0xff] }
  0x9d   : > { %584 = vmatpush.bf16.msra.mxu1 %v1061_v18  ;;  %1123 = vmatpush.bf16.msra.mxu3 %v1061_v18  ;;  %v1092_v50 = vld [vmem:[%s1890_s20 + $0x20] sm:$0xff]  ;;  %v1093_v52 = vld [vmem:[%s1890_s20 + $0x28] sm:$0xff]  ;;  %v1091_v55 = vld [vmem:[%s1890_s20 + $0x18] sm:$0xff] }
  0x9e   : > { %v1095_v56 = vld [vmem:[%s1890_s20 + $0x38] sm:$0xff]  ;;  %v341_v57 = vld [vmem:[#allocation2 + $0xb0] sm:$0xff]  ;;  %v342_v58 = vld [vmem:[#allocation2] sm:$0xff] }
  0x9f   : > { %v357_v63 = vld [vmem:[#allocation2 + $0x38] sm:$0xff]  ;;  %v359_v11 = vld [vmem:[#allocation2 + $0x40] sm:$0xff]  ;;  %v360_v12 = vld [vmem:[#allocation2 + $0xc8] sm:$0xff] }
  0xa0   : > { %536 = vmatpush.bf16.msra.mxu0 %v1049_v23  ;;  %1116 = vmatpush.bf16.msra.mxu2 %v1049_v23  ;;  %v358_v0 = vld [vmem:[#allocation2 + $0x58] sm:$0xff]  ;;  %v345_v14 = vld [vmem:[#allocation2 + $0x50] sm:$0xff]  ;;  %v346_v17 = vld [vmem:[#allocation2 + $0x68] sm:$0xff] }
  0xa1   : > { %585 = vmatpush.bf16.msra.mxu1 %v1053_v24  ;;  %1124 = vmatpush.bf16.msra.mxu3 %v1053_v24  ;;  %v343_v2 = vld [vmem:[#allocation2 + $0xd8] sm:$0xff]  ;;  %v361_v23 = vld [vmem:[#allocation2 + $0xe0] sm:$0xff]  ;;  %v362_v24 = vld [vmem:[#allocation2 + $0x90] sm:$0xff]  ;;  %p1078_p11 = scmp.ne.s32.totalorder %s2158_s18, 1 }
  0xa2   : > { %v344_v5 = vld [vmem:[#allocation2 + $0x18] sm:$0xff]  ;;  %v347_v26 = vld [vmem:[#allocation2 + $0x30] sm:$0xff]  ;;  %v349_v38 = vld [vmem:[#allocation2 + $0x80] sm:$0xff] }
  0xa4   : > { %537 = vmatpush.bf16.msra.mxu0 %v1041_v29  ;;  %1117 = vmatpush.bf16.msra.mxu2 %v1041_v29  ;;  %v348_v29 = vld [vmem:[#allocation2 + $0x48] sm:$0xff] }
  0xa5   : > { %586 = vmatpush.bf16.msra.mxu1 %v1045_v30  ;;  %1125 = vmatpush.bf16.msra.mxu3 %v1045_v30 }
  0xa8   : > { %538 = vmatpush.bf16.msra.mxu0 %v1033_v35  ;;  %1118 = vmatpush.bf16.msra.mxu2 %v1033_v35  ;;  %v363_v35 = vld [vmem:[#allocation2 + $0x70] sm:$0xff] }
  0xa9   : > { %587 = vmatpush.bf16.msra.mxu1 %v1037_v36  ;;  %1126 = vmatpush.bf16.msra.mxu3 %v1037_v36  ;;  %v364_v36 = vld [vmem:[#allocation2 + $0xc0] sm:$0xff] }
  0xac   : > { %539 = vmatpush.bf16.msra.mxu0 %v1025_v41  ;;  %1119 = vmatpush.bf16.msra.mxu2 %v1025_v41  ;;  %v350_v41 = vld [vmem:[#allocation2 + $0x88] sm:$0xff] }
  0xad   : > { %588 = vmatpush.bf16.msra.mxu1 %v1029_v42  ;;  %1127 = vmatpush.bf16.msra.mxu3 %v1029_v42 }
  0xb0   : > { %540 = vmatpush.bf16.msra.mxu0 %v1017_v47  ;;  %1120 = vmatpush.bf16.msra.mxu2 %v1017_v47  ;;  %v365_v47 = vld [vmem:[#allocation2 + $0xa8] sm:$0xff] }
  0xb1   : > { %589 = vmatpush.bf16.msra.mxu1 %v1021_v48  ;;  %1128 = vmatpush.bf16.msra.mxu3 %v1021_v48  ;;  %v366_v48 = vld [vmem:[#allocation2 + $0xd0] sm:$0xff] }
  0xb3   : > { %541 = vmatmul.bf16.vlgmr.msra.gmra.mxu0 %v1088_v49  ;;  %561 = vmatmul.bf16.vlgmr.msra.gmra.mxu2 %v1092_v50 }
  0xb4   : > { %590 = vmatmul.bf16.vlgmr.msra.gmra.mxu1 %v1088_v49  ;;  %610 = vmatmul.bf16.vlgmr.msra.gmra.mxu3 %v1092_v50  ;;  %v351_v50 = vld [vmem:[#allocation2 + $0xe8] sm:$0xff] }
  0xc3   : > { %546 = vmatmul.bf16.gmra.mxu0 %v1089_v51  ;;  %566 = vmatmul.bf16.gmra.mxu2 %v1093_v52 }
  0xc4   : > { %595 = vmatmul.bf16.gmra.mxu1 %v1089_v51  ;;  %615 = vmatmul.bf16.gmra.mxu3 %v1093_v52 }
  0xd3   : > { %551 = vmatmul.bf16.gmra.mxu0 %v1090_v53  ;;  %571 = vmatmul.bf16.gmra.mxu2 %v1094_v54 }
  0xd4   : > { %600 = vmatmul.bf16.gmra.mxu1 %v1090_v53  ;;  %620 = vmatmul.bf16.gmra.mxu3 %v1094_v54  ;;  %v352_v53 = vld [vmem:[#allocation2 + $0xb8] sm:$0xff] }
  0xe3   : > { %556 = vmatmul.bf16.gmra.mxu0 %v1091_v55  ;;  %576 = vmatmul.bf16.gmra.mxu2 %v1095_v56 }
  0xe4   : > { %605 = vmatmul.bf16.gmra.mxu1 %v1091_v55  ;;  %625 = vmatmul.bf16.gmra.mxu3 %v1095_v56 }
 0x130   : > { %v542_v59 = vpop.f32.mrf.mxu0 }
 0x131   : > { %v631_v60 = vadd.f32 %v542_v59, %v341_v57  ;;  %v591_v61 = vpop.f32.mrf.mxu1  ;;  %v367_v59 = vld [vmem:[#allocation2 + $0x10] sm:$0xff] }
 0x132   : > { %v632_v62 = vadd.f32 %v591_v61, %v342_v58 }
 0x133   : > { %663 = vst [vmem:[#allocation2 + $0xb0] sm:$0xff] %v631_v60  ;;  %v368_v60 = vld [vmem:[#allocation2 + $0x28] sm:$0xff] }
 0x134   : > { %664 = vst [vmem:[#allocation2] sm:$0xff] %v632_v62  ;;  %v353_v62 = vld [vmem:[#allocation2 + $0x60] sm:$0xff] }
 0x136   : > { %v562_v1 = vpop.f32.mrf.mxu2 }
 0x137   : > { %v647_v3 = vadd.f32 %v562_v1, %v357_v63  ;;  %v611_v4 = vpop.f32.mrf.mxu3  ;;  %v354_v1 = vld [vmem:[#allocation2 + $0xf0] sm:$0xff] }
 0x138   : > { %v648_v6 = vadd.f32 %v611_v4, %v358_v0  ;;  %v544_v7 = vpop.f32.mrf.mxu0 }
 0x139   : > { %679 = vst [vmem:[#allocation2 + $0x38] sm:$0xff] %v647_v3  ;;  %v633_v8 = vadd.f32 %v544_v7, %v343_v2  ;;  %v593_v9 = vpop.f32.mrf.mxu1  ;;  %v369_v7 = vld [vmem:[#allocation2 + $0xa0] sm:$0xff] }
 0x13a   : > { %680 = vst [vmem:[#allocation2 + $0x58] sm:$0xff] %v648_v6  ;;  %v634_v10 = vadd.f32 %v593_v9, %v344_v5 }
 0x13b   : > { %665 = vst [vmem:[#allocation2 + $0xd8] sm:$0xff] %v633_v8  ;;  %v370_v8 = vld [vmem:[#allocation2 + $0xf8] sm:$0xff] }
 0x13c   : > { %666 = vst [vmem:[#allocation2 + $0x18] sm:$0xff] %v634_v10  ;;  %v355_v10 = vld [vmem:[#allocation2 + $0x8] sm:$0xff] }
 0x13e   : > { %v564_v13 = vpop.f32.mrf.mxu2 }
 0x13f   : > { %v649_v15 = vadd.f32 %v564_v13, %v359_v11  ;;  %v613_v16 = vpop.f32.mrf.mxu3  ;;  %v356_v13 = vld [vmem:[#allocation2 + $0x78] sm:$0xff] }
 0x140   : > { %v650_v18 = vadd.f32 %v613_v16, %v360_v12  ;;  %v547_v19 = vpop.f32.mrf.mxu0 }
 0x141   : > { %681 = vst [vmem:[#allocation2 + $0x40] sm:$0xff] %v649_v15  ;;  %v635_v20 = vadd.f32 %v547_v19, %v345_v14  ;;  %v596_v21 = vpop.f32.mrf.mxu1  ;;  %v371_v19 = vld [vmem:[#allocation2 + $0x20] sm:$0xff] }
 0x142   : > { %682 = vst [vmem:[#allocation2 + $0xc8] sm:$0xff] %v650_v18  ;;  %v636_v22 = vadd.f32 %v596_v21, %v346_v17 }
 0x143   : > { %667 = vst [vmem:[#allocation2 + $0x50] sm:$0xff] %v635_v20  ;;  %v372_v20 = vld [vmem:[#allocation2 + $0x98] sm:$0xff] }
 0x144   : > { %668 = vst [vmem:[#allocation2 + $0x68] sm:$0xff] %v636_v22 }
 0x146   : > { %v567_v25 = vpop.f32.mrf.mxu2 }
 0x147   : > { %v651_v27 = vadd.f32 %v567_v25, %v361_v23  ;;  %v616_v28 = vpop.f32.mrf.mxu3 }
 0x148   : > { %v652_v30 = vadd.f32 %v616_v28, %v362_v24  ;;  %v549_v31 = vpop.f32.mrf.mxu0 }
 0x149   : > { %683 = vst [vmem:[#allocation2 + $0xe0] sm:$0xff] %v651_v27  ;;  %v637_v32 = vadd.f32 %v549_v31, %v347_v26  ;;  %v598_v33 = vpop.f32.mrf.mxu1 }
 0x14a   : > { %684 = vst [vmem:[#allocation2 + $0x90] sm:$0xff] %v652_v30  ;;  %v638_v34 = vadd.f32 %v598_v33, %v348_v29 }
 0x14b   : > { %669 = vst [vmem:[#allocation2 + $0x30] sm:$0xff] %v637_v32 }
 0x14c   : > { %670 = vst [vmem:[#allocation2 + $0x48] sm:$0xff] %v638_v34 }
 0x14e   : > { %v569_v37 = vpop.f32.mrf.mxu2 }
 0x14f   : > { %v653_v39 = vadd.f32 %v569_v37, %v363_v35  ;;  %v618_v40 = vpop.f32.mrf.mxu3 }
 0x150   : > { %v654_v42 = vadd.f32 %v618_v40, %v364_v36  ;;  %v552_v43 = vpop.f32.mrf.mxu0 }
 0x151   : > { %685 = vst [vmem:[#allocation2 + $0x70] sm:$0xff] %v653_v39  ;;  %v639_v44 = vadd.f32 %v552_v43, %v349_v38  ;;  %v601_v45 = vpop.f32.mrf.mxu1 }
 0x152   : > { %686 = vst [vmem:[#allocation2 + $0xc0] sm:$0xff] %v654_v42  ;;  %v640_v46 = vadd.f32 %v601_v45, %v350_v41 }
 0x153   : > { %671 = vst [vmem:[#allocation2 + $0x80] sm:$0xff] %v639_v44 }
 0x154   : > { %672 = vst [vmem:[#allocation2 + $0x88] sm:$0xff] %v640_v46 }
 0x156   : > { %v572_v49 = vpop.f32.mrf.mxu2 }
 0x157   : > { %v655_v51 = vadd.f32 %v572_v49, %v365_v47  ;;  %v621_v52 = vpop.f32.mrf.mxu3 }
 0x158   : > { %v656_v54 = vadd.f32 %v621_v52, %v366_v48  ;;  %v554_v55 = vpop.f32.mrf.mxu0 }
 0x159   : > { %687 = vst [vmem:[#allocation2 + $0xa8] sm:$0xff] %v655_v51  ;;  %v641_v56 = vadd.f32 %v554_v55, %v351_v50  ;;  %v603_v57 = vpop.f32.mrf.mxu1 }
 0x15a   : > { %688 = vst [vmem:[#allocation2 + $0xd0] sm:$0xff] %v656_v54  ;;  %v642_v58 = vadd.f32 %v603_v57, %v352_v53 }
 0x15b   : > { %673 = vst [vmem:[#allocation2 + $0xe8] sm:$0xff] %v641_v56 }
 0x15c   : > { %674 = vst [vmem:[#allocation2 + $0xb8] sm:$0xff] %v642_v58 }
 0x15e   : > { %v574_v61 = vpop.f32.mrf.mxu2 }
 0x15f   : > { %v657_v63 = vadd.f32 %v574_v61, %v367_v59  ;;  %v623_v0 = vpop.f32.mrf.mxu3 }
 0x160   : > { %v658_v2 = vadd.f32 %v623_v0, %v368_v60  ;;  %v557_v3 = vpop.f32.mrf.mxu0 }
 0x161   : > { %689 = vst [vmem:[#allocation2 + $0x10] sm:$0xff] %v657_v63  ;;  %v643_v4 = vadd.f32 %v557_v3, %v353_v62  ;;  %v606_v5 = vpop.f32.mrf.mxu1 }
 0x162   : > { %690 = vst [vmem:[#allocation2 + $0x28] sm:$0xff] %v658_v2  ;;  %v644_v6 = vadd.f32 %v606_v5, %v354_v1 }
 0x163   : > { %675 = vst [vmem:[#allocation2 + $0x60] sm:$0xff] %v643_v4 }
 0x164   : > { %676 = vst [vmem:[#allocation2 + $0xf0] sm:$0xff] %v644_v6 }
 0x166   : > { %v577_v9 = vpop.f32.mrf.mxu2 }
 0x167   : > { %v659_v11 = vadd.f32 %v577_v9, %v369_v7  ;;  %v626_v12 = vpop.f32.mrf.mxu3 }
 0x168   : > { %v660_v14 = vadd.f32 %v626_v12, %v370_v8  ;;  %v559_v15 = vpop.f32.mrf.mxu0 }
 0x169   : > { %691 = vst [vmem:[#allocation2 + $0xa0] sm:$0xff] %v659_v11  ;;  %v645_v16 = vadd.f32 %v559_v15, %v355_v10  ;;  %v608_v17 = vpop.f32.mrf.mxu1 }
 0x16a   : > { %692 = vst [vmem:[#allocation2 + $0xf8] sm:$0xff] %v660_v14  ;;  %v646_v18 = vadd.f32 %v608_v17, %v356_v13 }
 0x16b   : > { %677 = vst [vmem:[#allocation2 + $0x8] sm:$0xff] %v645_v16 }
 0x16c   : > { %678 = vst [vmem:[#allocation2 + $0x78] sm:$0xff] %v646_v18 }
 0x16e   : > { %v579_v21 = vpop.f32.mrf.mxu2  ;;  %698 = sbr.rel (%p1078_p11) target bundleno = 395 (0x18b), region = 52 }
 0x16f   : > { %v661_v22 = vadd.f32 %v579_v21, %v371_v19  ;;  %v628_v23 = vpop.f32.mrf.mxu3 }
 0x170   : > { %v662_v24 = vadd.f32 %v628_v23, %v372_v20 }
 0x171   : > { %693 = vst [vmem:[#allocation2 + $0x20] sm:$0xff] %v661_v22 }
 0x172   : > { %694 = vst [vmem:[#allocation2 + $0x98] sm:$0xff] %v662_v24 }
 0x173   : > { %v699_v25 = vld [vmem:[#allocation2 + $0xb0] sm:$0xff]  ;;  %v700_v26 = vld [vmem:[#allocation2] sm:$0xff]  ;;  %v701_v30 = vld [vmem:[#allocation2 + $0xd8] sm:$0xff] }
 0x174   : > { %v731_v27 = vld [vmem:[%s265_s6] sm:$0x3]  ;;  %v702_v31 = vld [vmem:[#allocation2 + $0x18] sm:$0xff]  ;;  %v703_v32 = vld [vmem:[#allocation2 + $0x50] sm:$0xff] }
 0x175   : > { %v1961_v28 = vperm.slane %v731_v27, 0  ;;  %v1963_v29 = vperm.slane %v731_v27, 1  ;;  %v704_v33 = vld [vmem:[#allocation2 + $0x68] sm:$0xff]  ;;  %v705_v34 = vld [vmem:[#allocation2 + $0x30] sm:$0xff]  ;;  %v707_v40 = vld [vmem:[#allocation2 + $0x80] sm:$0xff] }
 0x176   : > { %v706_v35 = vld [vmem:[#allocation2 + $0x48] sm:$0xff]  ;;  %v710_v47 = vld [vmem:[#allocation2 + $0xb8] sm:$0xff]  ;;  %v711_v48 = vld [vmem:[#allocation2 + $0x60] sm:$0xff] }
 0x177   : > { %v737_v36 = vadd.f32 %v1961_v28, %v699_v25  ;;  %v738_v37 = vadd.f32 %v1963_v29, %v700_v26  ;;  %v739_v38 = vadd.f32 %v1961_v28, %v701_v30  ;;  %v740_v39 = vadd.f32 %v1963_v29, %v702_v31  ;;  %v708_v41 = vld [vmem:[#allocation2 + $0x88] sm:$0xff]  ;;  %v712_v49 = vld [vmem:[#allocation2 + $0xf0] sm:$0xff]  ;;  %v714_v55 = vld [vmem:[#allocation2 + $0x78] sm:$0xff] }
 0x178   : > { %v709_v42 = vld [vmem:[#allocation2 + $0xe8] sm:$0xff]  ;;  %v741_v43 = vadd.f32 %v1961_v28, %v703_v32  ;;  %v742_v44 = vadd.f32 %v1963_v29, %v704_v33  ;;  %v743_v45 = vadd.f32 %v1961_v28, %v705_v34  ;;  %v744_v46 = vadd.f32 %v1963_v29, %v706_v35  ;;  %v715_v56 = vld [vmem:[#allocation2 + $0x38] sm:$0xff]  ;;  %v717_v62 = vld [vmem:[#allocation2 + $0x40] sm:$0xff] }
 0x179   : > { %v769_v50 = vpack.c.bf16 %v738_v37, %v737_v36  ;;  %v770_v51 = vpack.c.bf16 %v740_v39, %v739_v38  ;;  %v745_v52 = vadd.f32 %v1961_v28, %v707_v40  ;;  %v746_v53 = vadd.f32 %v1963_v29, %v708_v41  ;;  %v713_v54 = vld [vmem:[#allocation2 + $0x8] sm:$0xff]  ;;  %v716_v61 = vld [vmem:[#allocation2 + $0x58] sm:$0xff]  ;;  %v719_v4 = vld [vmem:[#allocation2 + $0xe0] sm:$0xff] }
 0x17a   : > { %v771_v57 = vpack.c.bf16 %v742_v44, %v741_v43  ;;  %v772_v58 = vpack.c.bf16 %v744_v46, %v743_v45  ;;  %v747_v59 = vadd.f32 %v1961_v28, %v709_v42  ;;  %v748_v60 = vadd.f32 %v1963_v29, %v710_v47  ;;  %v718_v63 = vld [vmem:[#allocation2 + $0xc8] sm:$0xff]  ;;  %v720_v5 = vld [vmem:[#allocation2 + $0x90] sm:$0xff]  ;;  %v722_v11 = vld [vmem:[#allocation2 + $0xc0] sm:$0xff] }
 0x17b   : > { %785 = vst [vmem:[%s1915_s13] sm:$0xff] %v769_v50  ;;  %v773_v0 = vpack.c.bf16 %v746_v53, %v745_v52  ;;  %v749_v1 = vadd.f32 %v1961_v28, %v711_v48  ;;  %v750_v2 = vadd.f32 %v1963_v29, %v712_v49  ;;  %v751_v3 = vadd.f32 %v1961_v28, %v713_v54  ;;  %v721_v6 = vld [vmem:[#allocation2 + $0x70] sm:$0xff]  ;;  %v723_v12 = vld [vmem:[#allocation2 + $0xa8] sm:$0xff]  ;;  %v727_v23 = vld [vmem:[#allocation2 + $0xa0] sm:$0xff] }
 0x17c   : > { %786 = vst [vmem:[%s1915_s13 + $0x8] sm:$0xff] %v770_v51  ;;  %v774_v7 = vpack.c.bf16 %v748_v60, %v747_v59  ;;  %v752_v8 = vadd.f32 %v1963_v29, %v714_v55  ;;  %v753_v9 = vadd.f32 %v1961_v28, %v715_v56  ;;  %v754_v10 = vadd.f32 %v1963_v29, %v716_v61  ;;  %v724_v13 = vld [vmem:[#allocation2 + $0xd0] sm:$0xff]  ;;  %v726_v19 = vld [vmem:[#allocation2 + $0x28] sm:$0xff]  ;;  %v728_v24 = vld [vmem:[#allocation2 + $0xf8] sm:$0xff] }
 0x17d   : > { %787 = vst [vmem:[%s1915_s13 + $0x10] sm:$0xff] %v771_v57  ;;  %v775_v14 = vpack.c.bf16 %v750_v2, %v749_v1  ;;  %v755_v15 = vadd.f32 %v1961_v28, %v717_v62  ;;  %v756_v16 = vadd.f32 %v1963_v29, %v718_v63  ;;  %v757_v17 = vadd.f32 %v1961_v28, %v719_v4  ;;  %v725_v18 = vld [vmem:[#allocation2 + $0x10] sm:$0xff]  ;;  %v729_v31 = vld [vmem:[#allocation2 + $0x20] sm:$0xff]  ;;  %v730_v32 = vld [vmem:[#allocation2 + $0x98] sm:$0xff] }
 0x17e   : > { %788 = vst [vmem:[%s1915_s13 + $0x18] sm:$0xff] %v772_v58  ;;  %v776_v20 = vpack.c.bf16 %v752_v8, %v751_v3  ;;  %v758_v21 = vadd.f32 %v1963_v29, %v720_v5  ;;  %v759_v22 = vadd.f32 %v1961_v28, %v721_v6  ;;  %v777_v25 = vpack.c.bf16 %v754_v10, %v753_v9 }
 0x17f   : > { %789 = vst [vmem:[%s1915_s13 + $0x20] sm:$0xff] %v773_v0  ;;  %v760_v26 = vadd.f32 %v1963_v29, %v722_v11  ;;  %v761_v27 = vadd.f32 %v1961_v28, %v723_v12  ;;  %v762_v30 = vadd.f32 %v1963_v29, %v724_v13  ;;  %v778_v33 = vpack.c.bf16 %v756_v16, %v755_v15 }
 0x180   : > { %790 = vst [vmem:[%s1915_s13 + $0x28] sm:$0xff] %v774_v7  ;;  %v763_v34 = vadd.f32 %v1961_v28, %v725_v18  ;;  %v764_v35 = vadd.f32 %v1963_v29, %v726_v19  ;;  %v779_v36 = vpack.c.bf16 %v758_v21, %v757_v17  ;;  %v765_v37 = vadd.f32 %v1961_v28, %v727_v23 }
 0x181   : > { %791 = vst [vmem:[%s1915_s13 + $0x30] sm:$0xff] %v775_v14  ;;  %v766_v38 = vadd.f32 %v1963_v29, %v728_v24  ;;  %v780_v39 = vpack.c.bf16 %v760_v26, %v759_v22  ;;  %v767_v40 = vadd.f32 %v1961_v28, %v729_v31  ;;  %v768_v41 = vadd.f32 %v1963_v29, %v730_v32 }
 0x182   : > { %792 = vst [vmem:[%s1915_s13 + $0x38] sm:$0xff] %v776_v20  ;;  %v781_v42 = vpack.c.bf16 %v762_v30, %v761_v27  ;;  %v782_v43 = vpack.c.bf16 %v764_v35, %v763_v34 }
 0x183   : > { %793 = vst [vmem:[%s1915_s13 + $0x40] sm:$0xff] %v777_v25  ;;  %v783_v44 = vpack.c.bf16 %v766_v38, %v765_v37  ;;  %v784_v45 = vpack.c.bf16 %v768_v41, %v767_v40 }
 0x184   : > { %794 = vst [vmem:[%s1915_s13 + $0x48] sm:$0xff] %v778_v33 }
 0x185   : > { %795 = vst [vmem:[%s1915_s13 + $0x50] sm:$0xff] %v779_v36 }
 0x186   : > { %796 = vst [vmem:[%s1915_s13 + $0x58] sm:$0xff] %v780_v39 }
 0x187   : > { %797 = vst [vmem:[%s1915_s13 + $0x60] sm:$0xff] %v781_v42 }
 0x188   : > { %798 = vst [vmem:[%s1915_s13 + $0x68] sm:$0xff] %v782_v43 }
 0x189   : > { %799 = vst [vmem:[%s1915_s13 + $0x70] sm:$0xff] %v783_v44 }
 0x18a   : > { %800 = vst [vmem:[%s1915_s13 + $0x78] sm:$0xff] %v784_v45 }
 0x18b PF: > { %s2159_s15 = sld [smem:[#allocation19_spill]]  ;;  %s817_s27 = sshll.u32 %s1915_s13, 4  ;;  %s818_s27 = int_to_ptr.vmem [resolvable:$true] %s817_s27 }
 0x18c   : > { %s2160_s4 = sld [smem:[#allocation20_spill]]  ;;  %s802_s3 = scalar_lea.sflag [#allocation5], %s296_s25 }
 0x18d   : > { %s2162_s10 = sld [smem:[#allocation33_spill]] }
 0x191   : > { %s1081_s12 = sshll.u32 %s2159_s15, 1 }
 0x192   : > { %s1112_s20 = sshll.u32 %s2160_s4, 7 }
 0x193   : > { %s814_s1 = sadd.s32 %s1112_s20, %s1081_s12  ;;  %s1424_s15 = scalar_lea.hbm %s2162_s10, 1024 }
 0x194   : > { %s1083_s29 = sshll.u32 %s814_s1, 2 }
 0x195   : > { %s816_s2 = scalar_lea.hbm %s2162_s10, %s1083_s29 }
 0x196   : > { %s819_s6 = sshll.u32 %s816_s2, 4  ;;  %s820_s6 = int_to_ptr.hbm [resolvable:$true] %s819_s6 }
 0x197   : > { %s1418_s9 = sshra.s32 %s820_s6, 4  ;;  %s1419_s9 = int_to_ptr.hbm [resolvable:$true] %s1418_s9 }
 0x198   : > { %s1420_s8 = scalar_lea.hbm %s1419_s9, 128  ;;  %p1425_p3 = scmp.lt.s32.totalorder %s1419_s9, %s2162_s10 }
 0x199   : > { %p1421_p10 = scmp.ne.s32.totalorder %s1419_s9, %s1420_s8  ;;  %p1426_p4 = scmp.lt.s32.totalorder %s1424_s15, %s1420_s8 }
 0x19b   : > { %p1422_p12 = pnand %p1421_p10, %p1866_p5  ;;  %p1427_p7 = por %p1426_p4, %p1425_p3 }
 0x19d   : > { %p1423_p2 = pneg %p1422_p12 }
 0x19f   : > { %p1428_p0 = pnand %p1427_p7, %p1423_p2 }
 0x1a1   : > { %1431 = shalt.err (!%p1428_p0)
}
 0x1a2   : > { %s1606_s25 = smov 128   ;;  %s1607_s26 = smov 512  }
 0x1a3   : > { %s1608_s20 = smov 8  }
 0x1a4   : > { %1135 = dma.vmem_to_hbm [thread:$0]  (%p1866_p5), %s818_s27, 2048, %s820_s6, %s802_s3, %s1606_s25, %s1607_s26, %s1608_s20  }
 0x1a5 PF: > { %s2163_s1 = sld [smem:[#allocation14_spill]]  ;;  %p1152_p9 = scmp.ge.s32.totalorder %s1598_s30, 2 }
 0x1a7   : > { %p1148_p8 = pnand %p1152_p9, %p1878_p1 }
 0x1a9   : > { %p1149_p13 = pneg %p1148_p8 }
 0x1ab   : > { %s834_s29 = sand.u32 1, %s2163_s1  }
 0x1ac   : > { %s835_s11 = scalar_lea.sflag [#allocation5], %s834_s29 }
 0x1ad   : > { %1521 = dma.done.wait (%p1149_p13), %s835_s11, 2048  }
 0x1ae   : > { %1523 = vsyncadd (%p1149_p13), %s835_s11, 4294965248  ;;  %s22_s30 = sadd.s32 1, %s1598_s30   ;;  %s2165_s12 = sld [smem:[#allocation15_spill]] }
 0x1af   : > { %p2036_p6 = scmp.ge.s32.totalorder %s22_s30, 18   ;;  %s2166_s5 = sld [smem:[#allocation17_spill]] }
 0x1b0   : > { %s2167_s20 = sld [smem:[#allocation25_spill]]  ;;  %s2173_s13 = smov %s1534_s14 }
 0x1b1   : > { %s2168_s0 = sld [smem:[#allocation29_spill]]  ;;  %s2175_s14 = smov %s1815_s24 }
 0x1b2   : > { %s2169_s27 = sld [smem:[#allocation21_spill]]  ;;  %s2176_s15 = smov %s1542_s16 }
 0x1b3   : > { %s2170_s26 = sld [smem:[#allocation22_spill]]  ;;  %s2178_s16 = smov %s1546_s17 }
 0x1b4   : > { %s2171_s2 = sld [smem:[#allocation23_spill]]  ;;  %s2179_s17 = smov %s1847_s7 }
 0x1b5   : > { %s2172_s6 = sld [smem:[#allocation24_spill]]  ;;  %s2180_s18 = smov %s1554_s19 }
 0x1b6   : > { %s2174_s29 = sld [smem:[#allocation28_spill]]  ;;  %s2181_s19 = smov %s2166_s5 }
 0x1b7   : > { %s2182_s21 = smov %s1566_s22  ;;  %s2183_s22 = smov %s1570_s23 }
 0x1b8   : > { %s2184_s23 = smov %s2168_s0  ;;  %s2185_s24 = smov %s2169_s27 }
 0x1b9   : > { %s2186_s25 = smov %s1590_s28  ;;  %21 = sbr.rel (!%p2036_p6) target bundleno = 20 (0x14), region = 109 }
 0x1ba   : > { %s2187_s27 = smov %s2171_s2 }
 0x1bb   : > { %s2188_s28 = smov %s2172_s6 }
 0x1be   :  { %841 = vsyncpa [#allocation4], 1 }
 0x1bf   :  { %843 = vsyncpa [#allocation4 + $0x1], 1 }
 0x1c0   :  { %844 = vsyncpa [#allocation7], 1 }
 0x1c1   :  { %846 = vsyncpa [#allocation7 + $0x1], 1 }
 0x1c2   :  { %847 = vsyncpa [#allocation5], 1 }
 0x1c3   :  { %849 = vsyncpa [#allocation5 + $0x1], 1 }

</bundles_post_ra>
